<compile_context>
chip_gen: v5e
topology: v5e:2x2
jax: 0.10.0
libtpu: 0.0.40
codegen_flags: <defaults>
</compile_context>

<pallas_src>
import numpy as np
import jax
import jax.numpy as jnp
from jax.experimental import pallas as pl
from jax.experimental.pallas import tpu as pltpu

# ----------------------------- config -------------------------------------
NUM_BODY_JOINTS = 23
NUM_JOINTS = NUM_BODY_JOINTS + 1          # global orient + body joints
NUM_BETAS = 10
NUM_TEMPLATE_VERTS = 64                   # synthetic SMPL template size
NUM_GARMENT_VERTS = 256                   # t-shirt vertices (multiple of 128)
BATCH = 2
MAX_TILE_N = 2048                         # lanes per grid step (VMEM-safe on all gens)


# ---------------- SMPL-style helpers (glue, plain JAX) ---------------------
def batch_rodrigues(rot_vecs):
    """(N, 3) axis-angle -> (N, 3, 3) rotation matrices."""
    angle = jnp.linalg.norm(rot_vecs + 1e-8, axis=1, keepdims=True)     # (N,1)
    rot_dir = rot_vecs / angle
    cos = jnp.cos(angle)[:, :, None]                                    # (N,1,1)
    sin = jnp.sin(angle)[:, :, None]
    rx, ry, rz = rot_dir[:, 0], rot_dir[:, 1], rot_dir[:, 2]
    zeros = jnp.zeros_like(rx)
    K = jnp.stack([zeros, -rz, ry, rz, zeros, -rx, -ry, rx, zeros],
                  axis=1).reshape(-1, 3, 3)
    ident = jnp.eye(3, dtype=rot_vecs.dtype)[None]
    return ident + sin * K + (1.0 - cos) * jnp.matmul(K, K)


def blend_shapes(betas, shape_disps):
    # betas: (B, L); shape_disps: (V, 3, L) -> (B, V, 3)
    return jnp.einsum('bl,mkl->bmk', betas, shape_disps)


def vertices2joints(J_regressor, vertices):
    # J_regressor: (J, V); vertices: (B, V, 3) -> (B, J, 3)
    return jnp.einsum('bik,ji->bjk', vertices, J_regressor)


def _transforms_mat(rot_mats, joints, parents):
    dtype = rot_mats.dtype
    rel_joints = joints.at[:, 1:].add(-joints[:, parents[1:]])
    top = jnp.concatenate([rot_mats, rel_joints[..., None]], axis=-1)     # (B,J,3,4)
    bottom = jnp.broadcast_to(jnp.array([0., 0., 0., 1.], dtype=dtype),
                              rot_mats.shape[:2] + (1, 4))
    return jnp.concatenate([top, bottom], axis=-2)                        # (B,J,4,4)


def _finish_rigid(transforms, joints):
    dtype = transforms.dtype
    posed_joints = transforms[:, :, :3, 3]
    joints_h = jnp.concatenate(
        [joints, jnp.zeros(joints.shape[:2] + (1,), dtype=dtype)], axis=-1)[..., None]
    correction = jnp.matmul(transforms, joints_h)                         # (B,J,4,1)
    rel_transforms = transforms - jnp.pad(correction,
                                          ((0, 0), (0, 0), (0, 0), (3, 0)))
    return posed_joints, rel_transforms


def batch_rigid_transform(rot_mats, joints, parents):
    """Levelized kinematic-chain composition: one batched 4x4 matmul per tree
    depth instead of one serial matmul per joint.  parents: static np.int32 (J,)."""
    transforms_mat = _transforms_mat(rot_mats, joints, parents)           # (B,J,4,4)
    J = parents.shape[0]
    depth = np.zeros(J, np.int32)
    for i in range(1, J):
        depth[i] = depth[parents[i]] + 1
    transforms = transforms_mat                                           # root already correct
    for d in range(1, int(depth.max()) + 1):
        idx = np.nonzero(depth == d)[0]
        pidx = parents[idx]
        composed = jnp.matmul(transforms[:, pidx], transforms_mat[:, idx])
        transforms = transforms.at[:, idx].set(composed)
    return _finish_rigid(transforms, joints)


def batch_rigid_transform_ref(rot_mats, joints, parents):
    """Reference (serial-loop) chain composition mirroring the PyTorch code."""
    transforms_mat = _transforms_mat(rot_mats, joints, parents)
    chain = [transforms_mat[:, 0]]
    for i in range(1, parents.shape[0]):
        chain.append(jnp.matmul(chain[int(parents[i])], transforms_mat[:, i]))
    transforms = jnp.stack(chain, axis=1)
    return _finish_rigid(transforms, joints)


# --------------------------- Pallas kernel ---------------------------------
def lbs_kernel(wt_ref, at_ref, v_ref, o_ref):
    # wt_ref: (J+1, TILE_N)   skinning weights^T (+ all-ones pseudo-joint row)
    # at_ref: (12, J+1)       top-3 rows of joint transforms^T (+ transl column)
    # v_ref : (3*B, TILE_N)   garment vertices, coord-major on sublanes
    # o_ref : (3*B, TILE_N)   posed vertices, same layout
    T = jnp.dot(at_ref[...], wt_ref[...],
                preferred_element_type=jnp.float32)        # (12, TILE_N); rows 3/7/11
    V = v_ref[...]                                         # already include +transl
    B = V.shape[0] // 3
    vx = V[:B]
    vy = V[B:2 * B]
    vz = V[2 * B:]
    for i in range(3):                                     # static unroll over x/y/z
        row = (T[4 * i + 0][None, :] * vx
               + T[4 * i + 1][None, :] * vy
               + T[4 * i + 2][None, :] * vz
               + T[4 * i + 3][None, :])
        o_ref[i * B:(i + 1) * B, :] = row                  # direct slab store, no concat


def lbs_pallas(vertices, joint_transforms, skinning_weights, transl):
    """vertices: (B, N, 3); joint_transforms: (1, J, 4, 4);
       skinning_weights: (N, J); transl: (3,) -> posed (B, N, 3)."""
    B, N, _ = vertices.shape
    J = skinning_weights.shape[1]
    assert N % 128 == 0, "N must be a multiple of 128 (lane width)"
    # Reference einsum 'nj,bjik->nik' sums over the pose batch axis; exact only for Bp == 1.
    assert joint_transforms.shape[0] == 1, "pose batch must be 1 (reference sums over it)"

    # Keep only the top 3 rows of each 4x4 (the homogeneous bottom row is never read).
    A = jnp.sum(joint_transforms, axis=0).astype(jnp.float32)            # (J, 4, 4)
    A12 = A[:, :3, :].reshape(J, 12)                                     # (J, 12)

    # Fold translation exactly via an augmented "pseudo-joint":
    #   extra weight row    = 1 for every vertex
    #   extra transform col = transl in the translation slots (3, 7, 11 of the 12-vec)
    t_col = jnp.zeros((12,), jnp.float32).at[jnp.array([3, 7, 11])].set(
        transl.astype(jnp.float32))
    AT = jnp.concatenate([A12.T, t_col[:, None]], axis=1)                # (12, J+1)
    # NOTE: casting WT to bf16 would cut the dominant HBM stream ~2x at realistic N,
    # but costs ~1e-3 relative error; kept f32 to preserve exact semantics here.
    WT = jnp.concatenate([skinning_weights.T.astype(jnp.float32),
                          jnp.ones((1, N), jnp.float32)], axis=0)        # (J+1, N)

    # (coord, batch) packed on the sublane axis: (3*B, N), row = coord*B + batch.
    # (Layout round-trip kept to preserve the (B, N, 3) interface; fused under jit.)
    Vc = jnp.transpose(vertices, (2, 0, 1)).astype(jnp.float32).reshape(3 * B, N)

    # Tile N so BlockSpec double-buffering overlaps input DMA, compute and writeback,
    # and per-tile VMEM stays far below every generation's scoped limit (incl. v5e 16 MiB).
    if N <= MAX_TILE_N:
        tile_n = N
    else:
        tile_n = MAX_TILE_N
        while N % tile_n != 0:
            tile_n -= 128

    out = pl.pallas_call(
        lbs_kernel,
        out_shape=jax.ShapeDtypeStruct((3 * B, N), jnp.float32),
        grid=(N // tile_n,),
        in_specs=[
            pl.BlockSpec((J + 1, tile_n), lambda i: (0, i)),
            pl.BlockSpec((12, J + 1), lambda i: (0, 0)),      # resident across tiles
            pl.BlockSpec((3 * B, tile_n), lambda i: (0, i)),
        ],
        out_specs=pl.BlockSpec((3 * B, tile_n), lambda i: (0, i)),
        compiler_params=pltpu.CompilerParams(
            dimension_semantics=("parallel",)),                # independent tiles (v7x megacore)
    )(WT, AT, Vc)
    return jnp.transpose(out.reshape(3, B, N), (1, 2, 0))                # (B, N, 3)


# ------------------------- TshirtPoser equivalent --------------------------
class TshirtPoserPallas:
    def __init__(self, model, lbs_weights, betas=None, body_pose=None,
                 global_orient=None, transl=None, reverse=False):
        self.model = model
        self.lbs_weights = lbs_weights
        self.body_pose = (body_pose if body_pose is not None else
                          jnp.broadcast_to(jnp.eye(3, dtype=jnp.float32),
                                           (1, NUM_BODY_JOINTS, 3, 3)))
        self.global_orient = (global_orient if global_orient is not None else
                              jnp.eye(3, dtype=jnp.float32).reshape(1, 1, 3, 3))
        self.betas = betas if betas is not None else jnp.zeros((1, NUM_BETAS), jnp.float32)
        self.transl = transl if transl is not None else jnp.zeros((1, 3), jnp.float32)
        self.reverse = reverse

        parents = np.asarray(model['parents'], np.int32)  # static under jit

        # Whole forward (SMPL glue + Pallas LBS) fused into one jitted device program.
        def _fwd(vertices, body_pose, global_orient, betas, transl,
                 v_template, shapedirs, J_regressor, lbs_w):
            # build_full_pose for an SMPL-layer model: [global_orient, body_pose]
            full_pose = jnp.concatenate([global_orient, body_pose], axis=1)  # (1,J,3,3)
            v_shaped = v_template[None] + blend_shapes(betas, shapedirs)
            Jlocs = vertices2joints(J_regressor, v_shaped)
            _, joint_transforms = batch_rigid_transform(full_pose, Jlocs, parents)
            return lbs_pallas(vertices, joint_transforms, lbs_w, transl[0])

        self._forward = jax.jit(_fwd)

    def __call__(self, vertices, body_pose=None, betas=None, global_orient=None,
                 transl=None, reverse=None):
        body_pose = body_pose if body_pose is not None else self.body_pose
        global_orient = global_orient if global_orient is not None else self.global_orient
        betas = betas if betas is not None else self.betas
        t = transl if transl is not None else self.transl
        _reverse = reverse if reverse is not None else self.reverse
        # TODO(synk): reverse=True path (per-vertex 4x4 T.inverse()) not implemented in-kernel.
        assert not _reverse, "unpose (T.inverse) path not implemented"

        return self._forward(vertices, body_pose, global_orient, betas, t,
                             self.model['v_template'], self.model['shapedirs'],
                             self.model['J_regressor'], self.lbs_weights)


# --------------------------------- main ------------------------------------
if __name__ == "__main__":
    key = jax.random.PRNGKey(0)
    ks = jax.random.split(key, 10)

    # deterministic synthetic SMPL-like model parameters (real SMPL kinematic tree)
    v_template = jax.random.normal(ks[0], (NUM_TEMPLATE_VERTS, 3), jnp.float32) * 0.1
    shapedirs = jax.random.normal(ks[1], (NUM_TEMPLATE_VERTS, 3, NUM_BETAS), jnp.float32) * 0.01
    jr = jax.random.uniform(ks[2], (NUM_JOINTS, NUM_TEMPLATE_VERTS), jnp.float32)
    J_regressor = jr / jnp.sum(jr, axis=1, keepdims=True)
    parents = np.array([-1, 0, 0, 0, 1, 2, 3, 4, 5, 6, 7, 8, 9, 9, 9, 12,
                        13, 14, 16, 17, 18, 19, 20, 21], np.int32)   # SMPL tree (depth ~7)

    lw = jax.random.uniform(ks[3], (NUM_GARMENT_VERTS, NUM_JOINTS), jnp.float32)
    lbs_weights = lw / jnp.sum(lw, axis=1, keepdims=True)

    body_pose = batch_rodrigues(
        jax.random.normal(ks[4], (NUM_BODY_JOINTS, 3), jnp.float32) * 0.2)[None]   # (1,23,3,3)
    global_orient = batch_rodrigues(
        jax.random.normal(ks[5], (1, 3), jnp.float32) * 0.2)[None]                  # (1,1,3,3)
    betas = jax.random.normal(ks[6], (1, NUM_BETAS), jnp.float32) * 0.5
    transl = jnp.array([[0.1, -0.2, 0.3]], jnp.float32)

    # garment (t-shirt) vertices fed to forward()
    vertices = jax.random.normal(ks[7], (BATCH, NUM_GARMENT_VERTS, 3), jnp.float32) * 0.3

    model = dict(v_template=v_template, shapedirs=shapedirs,
                 J_regressor=J_regressor, parents=parents)

    poser = TshirtPoserPallas(model, lbs_weights, betas=betas, body_pose=body_pose,
                              global_orient=global_orient, transl=transl, reverse=False)
    out = jax.block_until_ready(poser(vertices))

    # pure-JAX reference mirroring the PyTorch forward exactly (serial-loop chain)
    full_pose = jnp.concatenate([global_orient, body_pose], axis=1)
    v_shaped = v_template[None] + blend_shapes(betas, shapedirs)
    Jlocs = vertices2joints(J_regressor, v_shaped)
    _, jt = batch_rigid_transform_ref(full_pose, Jlocs, parents)
    Tm = jnp.einsum('nj,bjik->nik', lbs_weights, jt)
    vh = jnp.concatenate([vertices,
                          jnp.ones(vertices.shape[:2] + (1,), jnp.float32)], axis=2)
    ref = jnp.einsum('nij,bnj->bni', Tm, vh)[:, :, :3] + transl

    assert out.shape == (BATCH, NUM_GARMENT_VERTS, 3)
    np.testing.assert_allclose(np.asarray(out), np.asarray(ref), rtol=2e-4, atol=2e-4)
    print("KERNEL_OK")
</pallas_src>

<mosaic_0001>
module attributes {stable_mosaic.version = 11 : i64} {
  func.func @lbs_kernel(%arg0: i32, %arg1: memref<25x256xf32, #tpu.memory_space<vmem>>, %arg2: memref<12x25xf32, #tpu.memory_space<vmem>>, %arg3: memref<6x256xf32, #tpu.memory_space<vmem>>, %arg4: memref<6x256xf32, #tpu.memory_space<vmem>>) attributes {dimension_semantics = [#tpu.dimension_semantics<parallel>], iteration_bounds = array<i64: 1>, scalar_prefetch = 0 : i64, scratch_operands = 0 : i64, tpu.core_type = #tpu.core_type<tc>, window_params = [{transform_indices = @transform_0, window_bounds = array<i64: 25, 256>}, {pipeline_mode = #tpu.pipeline_mode<synchronous>, transform_indices = @transform_1, window_bounds = array<i64: 12, 25>}, {transform_indices = @transform_2, window_bounds = array<i64: 6, 256>}, {transform_indices = @transform_3, window_bounds = array<i64: 6, 256>}]} {
    %c0 = arith.constant 0 : index
    %c0_0 = arith.constant 0 : index
    %0 = vector.load %arg2[%c0, %c0_0] : memref<12x25xf32, #tpu.memory_space<vmem>>, vector<12x25xf32>
    %c0_1 = arith.constant 0 : index
    %c0_2 = arith.constant 0 : index
    %1 = vector.load %arg1[%c0_1, %c0_2] : memref<25x256xf32, #tpu.memory_space<vmem>>, vector<25x256xf32>
    %cst = arith.constant dense<0.000000e+00> : vector<12x256xf32>
    %2 = tpu.matmul %0, %1, %cst {dimension_numbers = #tpu.dot_dimension_numbers<[1], [0], [0], [1], [0, 0, 1, 1], [], []>} : vector<12x25xf32>, vector<25x256xf32>, vector<12x256xf32> -> vector<12x256xf32>
    %c0_3 = arith.constant 0 : index
    %c0_4 = arith.constant 0 : index
    %3 = vector.load %arg3[%c0_3, %c0_4] : memref<6x256xf32, #tpu.memory_space<vmem>>, vector<6x256xf32>
    %4 = vector.extract_strided_slice %3 {offsets = [0, 0], sizes = [2, 256], strides = [1, 1]} : vector<6x256xf32> to vector<2x256xf32>
    %5 = vector.extract_strided_slice %3 {offsets = [2, 0], sizes = [2, 256], strides = [1, 1]} : vector<6x256xf32> to vector<2x256xf32>
    %6 = vector.extract_strided_slice %3 {offsets = [4, 0], sizes = [2, 256], strides = [1, 1]} : vector<6x256xf32> to vector<2x256xf32>
    %7 = vector.extract_strided_slice %2 {offsets = [0, 0], sizes = [1, 256], strides = [1, 1]} : vector<12x256xf32> to vector<1x256xf32>
    %8 = vector.shape_cast %7 : vector<1x256xf32> to vector<256xf32>
    %9 = vector.shape_cast %8 : vector<256xf32> to vector<1x256xf32>
    %10 = vector.broadcast %9 : vector<1x256xf32> to vector<2x256xf32>
    %11 = arith.mulf %10, %4 : vector<2x256xf32>
    %12 = vector.extract_strided_slice %2 {offsets = [1, 0], sizes = [1, 256], strides = [1, 1]} : vector<12x256xf32> to vector<1x256xf32>
    %13 = vector.shape_cast %12 : vector<1x256xf32> to vector<256xf32>
    %14 = vector.shape_cast %13 : vector<256xf32> to vector<1x256xf32>
    %15 = vector.broadcast %14 : vector<1x256xf32> to vector<2x256xf32>
    %16 = arith.mulf %15, %5 : vector<2x256xf32>
    %17 = arith.addf %11, %16 : vector<2x256xf32>
    %18 = vector.extract_strided_slice %2 {offsets = [2, 0], sizes = [1, 256], strides = [1, 1]} : vector<12x256xf32> to vector<1x256xf32>
    %19 = vector.shape_cast %18 : vector<1x256xf32> to vector<256xf32>
    %20 = vector.shape_cast %19 : vector<256xf32> to vector<1x256xf32>
    %21 = vector.broadcast %20 : vector<1x256xf32> to vector<2x256xf32>
    %22 = arith.mulf %21, %6 : vector<2x256xf32>
    %23 = arith.addf %17, %22 : vector<2x256xf32>
    %24 = vector.extract_strided_slice %2 {offsets = [3, 0], sizes = [1, 256], strides = [1, 1]} : vector<12x256xf32> to vector<1x256xf32>
    %25 = vector.shape_cast %24 : vector<1x256xf32> to vector<256xf32>
    %26 = vector.shape_cast %25 : vector<256xf32> to vector<1x256xf32>
    %27 = vector.broadcast %26 : vector<1x256xf32> to vector<2x256xf32>
    %28 = arith.addf %23, %27 : vector<2x256xf32>
    %c0_5 = arith.constant 0 : index
    %c0_6 = arith.constant 0 : index
    %29 = vector.load %arg4[%c0_5, %c0_6] : memref<6x256xf32, #tpu.memory_space<vmem>>, vector<2x256xf32>
    tpu.vector_store %arg4[%c0_5, %c0_6], %28 {strides = array<i32>} : memref<6x256xf32, #tpu.memory_space<vmem>>, vector<2x256xf32>,
    %30 = vector.extract_strided_slice %2 {offsets = [4, 0], sizes = [1, 256], strides = [1, 1]} : vector<12x256xf32> to vector<1x256xf32>
    %31 = vector.shape_cast %30 : vector<1x256xf32> to vector<256xf32>
    %32 = vector.shape_cast %31 : vector<256xf32> to vector<1x256xf32>
    %33 = vector.broadcast %32 : vector<1x256xf32> to vector<2x256xf32>
    %34 = arith.mulf %33, %4 : vector<2x256xf32>
    %35 = vector.extract_strided_slice %2 {offsets = [5, 0], sizes = [1, 256], strides = [1, 1]} : vector<12x256xf32> to vector<1x256xf32>
    %36 = vector.shape_cast %35 : vector<1x256xf32> to vector<256xf32>
    %37 = vector.shape_cast %36 : vector<256xf32> to vector<1x256xf32>
    %38 = vector.broadcast %37 : vector<1x256xf32> to vector<2x256xf32>
    %39 = arith.mulf %38, %5 : vector<2x256xf32>
    %40 = arith.addf %34, %39 : vector<2x256xf32>
    %41 = vector.extract_strided_slice %2 {offsets = [6, 0], sizes = [1, 256], strides = [1, 1]} : vector<12x256xf32> to vector<1x256xf32>
    %42 = vector.shape_cast %41 : vector<1x256xf32> to vector<256xf32>
    %43 = vector.shape_cast %42 : vector<256xf32> to vector<1x256xf32>
    %44 = vector.broadcast %43 : vector<1x256xf32> to vector<2x256xf32>
    %45 = arith.mulf %44, %6 : vector<2x256xf32>
    %46 = arith.addf %40, %45 : vector<2x256xf32>
    %47 = vector.extract_strided_slice %2 {offsets = [7, 0], sizes = [1, 256], strides = [1, 1]} : vector<12x256xf32> to vector<1x256xf32>
    %48 = vector.shape_cast %47 : vector<1x256xf32> to vector<256xf32>
    %49 = vector.shape_cast %48 : vector<256xf32> to vector<1x256xf32>
    %50 = vector.broadcast %49 : vector<1x256xf32> to vector<2x256xf32>
    %51 = arith.addf %46, %50 : vector<2x256xf32>
    %c2 = arith.constant 2 : index
    %c0_7 = arith.constant 0 : index
    %52 = vector.load %arg4[%c2, %c0_7] : memref<6x256xf32, #tpu.memory_space<vmem>>, vector<2x256xf32>
    tpu.vector_store %arg4[%c2, %c0_7], %51 {strides = array<i32>} : memref<6x256xf32, #tpu.memory_space<vmem>>, vector<2x256xf32>,
    %53 = vector.extract_strided_slice %2 {offsets = [8, 0], sizes = [1, 256], strides = [1, 1]} : vector<12x256xf32> to vector<1x256xf32>
    %54 = vector.shape_cast %53 : vector<1x256xf32> to vector<256xf32>
    %55 = vector.shape_cast %54 : vector<256xf32> to vector<1x256xf32>
    %56 = vector.broadcast %55 : vector<1x256xf32> to vector<2x256xf32>
    %57 = arith.mulf %56, %4 : vector<2x256xf32>
    %58 = vector.extract_strided_slice %2 {offsets = [9, 0], sizes = [1, 256], strides = [1, 1]} : vector<12x256xf32> to vector<1x256xf32>
    %59 = vector.shape_cast %58 : vector<1x256xf32> to vector<256xf32>
    %60 = vector.shape_cast %59 : vector<256xf32> to vector<1x256xf32>
    %61 = vector.broadcast %60 : vector<1x256xf32> to vector<2x256xf32>
    %62 = arith.mulf %61, %5 : vector<2x256xf32>
    %63 = arith.addf %57, %62 : vector<2x256xf32>
    %64 = vector.extract_strided_slice %2 {offsets = [10, 0], sizes = [1, 256], strides = [1, 1]} : vector<12x256xf32> to vector<1x256xf32>
    %65 = vector.shape_cast %64 : vector<1x256xf32> to vector<256xf32>
    %66 = vector.shape_cast %65 : vector<256xf32> to vector<1x256xf32>
    %67 = vector.broadcast %66 : vector<1x256xf32> to vector<2x256xf32>
    %68 = arith.mulf %67, %6 : vector<2x256xf32>
    %69 = arith.addf %63, %68 : vector<2x256xf32>
    %70 = vector.extract_strided_slice %2 {offsets = [11, 0], sizes = [1, 256], strides = [1, 1]} : vector<12x256xf32> to vector<1x256xf32>
    %71 = vector.shape_cast %70 : vector<1x256xf32> to vector<256xf32>
    %72 = vector.shape_cast %71 : vector<256xf32> to vector<1x256xf32>
    %73 = vector.broadcast %72 : vector<1x256xf32> to vector<2x256xf32>
    %74 = arith.addf %69, %73 : vector<2x256xf32>
    %c4 = arith.constant 4 : index
    %c0_8 = arith.constant 0 : index
    %75 = vector.load %arg4[%c4, %c0_8] : memref<6x256xf32, #tpu.memory_space<vmem>>, vector<2x256xf32>
    tpu.vector_store %arg4[%c4, %c0_8], %74 {strides = array<i32>} : memref<6x256xf32, #tpu.memory_space<vmem>>, vector<2x256xf32>,
    return
  }
  func.func @transform_0(%arg0: i32) -> (i32, i32) {
    %c0_i32 = arith.constant 0 : i32
    %c0_i32_0 = arith.constant 0 : i32
    return %c0_i32, %arg0 : i32, i32
  }
  func.func @transform_1(%arg0: i32) -> (i32, i32) {
    %c0_i32 = arith.constant 0 : i32
    %c0_i32_0 = arith.constant 0 : i32
    %c0_i32_1 = arith.constant 0 : i32
    return %c0_i32, %c0_i32_0 : i32, i32
  }
  func.func @transform_2(%arg0: i32) -> (i32, i32) {
    %c0_i32 = arith.constant 0 : i32
    %c0_i32_0 = arith.constant 0 : i32
    return %c0_i32, %arg0 : i32, i32
  }
  func.func @transform_3(%arg0: i32) -> (i32, i32) {
    %c0_i32 = arith.constant 0 : i32
    %c0_i32_0 = arith.constant 0 : i32
    return %c0_i32, %arg0 : i32, i32
  }
}

</mosaic_0001>

<bundles_post_ra>
// kernel: _fwd.1
= control target key start
LH: loop header
LB: loop body
LE: loop exit
PB: predicated region body
PF: predicated region fallthrough
CT: control target
= control target key end

     0   :  { %vm31_vm0 = vcmask 1040384   ;;  %vm24_vm1 = vcmask 203776   ;;  %s302_s0 = inlined_call_operand.vmem [shape: f32[25,256], index: 0, kind: input, shape index: {}]   ;;  %s303_s1 = inlined_call_operand.vmem [shape: f32[12,25], index: 1, kind: input, shape index: {}]   ;;  %s304_s2 = inlined_call_operand.vmem [shape: f32[6,256], index: 2, kind: input, shape index: {}]   ;;  %s305_s3 = inlined_call_operand.vmem [shape: f32[6,256], index: 3, kind: output, shape index: {}]  }
   0x1   :  { %v22_v0 = vld [vmem:[%s302_s0 + $0x30] sm:$0x1]  ;;  %v23_v1 = vld [vmem:[%s302_s0 + $0x38] sm:$0x1]  ;;  %v20_v2 = vld [vmem:[%s302_s0 + $0x20] sm:$0xff] }
   0x2   :  { %204 = vmatpush.msk.msra.mxu0 %vm31_vm0, %v22_v0  ;;  %210 = vmatpush.msk.msra.mxu2 %vm31_vm0, %v22_v0  ;;  %v21_v3 = vld [vmem:[%s302_s0 + $0x28] sm:$0xff]  ;;  %v18_v4 = vld [vmem:[%s302_s0 + $0x10] sm:$0xff]  ;;  %v19_v5 = vld [vmem:[%s302_s0 + $0x18] sm:$0xff] }
   0x3   :  { %207 = vmatpush.msk.msra.mxu1 %vm31_vm0, %v23_v1  ;;  %214 = vmatpush.msk.msra.mxu3 %vm31_vm0, %v23_v1  ;;  %v16_v6 = vld [vmem:[%s302_s0] sm:$0xff]  ;;  %v17_v7 = vld [vmem:[%s302_s0 + $0x8] sm:$0xff] }
   0x4   :  { %51 = vmatpush.msra.mxu0 %v20_v2  ;;  %211 = vmatpush.msra.mxu2 %v20_v2  ;;  %v14_v8 = vld [vmem:[%s303_s1] sm:$0xff]  ;;  %v15_v9 = vld [vmem:[%s303_s1 + $0x8] sm:$0xf] }
   0x5   :  { %74 = vmatpush.msra.mxu1 %v21_v3  ;;  %215 = vmatpush.msra.mxu3 %v21_v3  ;;  %v84_v11 = vld [vmem:[%s304_s2] sm:$0x3f]  ;;  %v85_v22 = vld [vmem:[%s304_s2 + $0x8] sm:$0x3f] }
   0x6   :  { %52 = vmatpush.msra.mxu0 %v18_v4  ;;  %212 = vmatpush.msra.mxu2 %v18_v4 }
   0x7   :  { %75 = vmatpush.msra.mxu1 %v19_v5  ;;  %216 = vmatpush.msra.mxu3 %v19_v5 }
   0x8   :  { %53 = vmatpush.msra.mxu0 %v16_v6  ;;  %213 = vmatpush.msra.mxu2 %v16_v6 }
   0x9   :  { %76 = vmatpush.msra.mxu1 %v17_v7  ;;  %217 = vmatpush.msra.mxu3 %v17_v7 }
   0xa   :  { %205 = vmatmul.msk.f32.vlgmr.msra.gmra.mxu0 %vm24_vm1, %v14_v8  ;;  %206 = vmatmul.msk.f32.vlgmr.msra.gmra.mxu2 %vm24_vm1, %v15_v9 }
   0xb   :  { %208 = vmatmul.msk.f32.vlgmr.msra.gmra.mxu1 %vm24_vm1, %v14_v8  ;;  %209 = vmatmul.msk.f32.vlgmr.msra.gmra.mxu3 %vm24_vm1, %v15_v9 }
  0x87   :  { %v55_v10 = vpop.f32.mrf.mxu0 }
  0x88   :  { %v86_v12 = vperm.slane %v55_v10, 0  ;;  %v90_v13 = vperm.slane %v55_v10, 1  ;;  %v102_v14 = vperm.slane %v55_v10, 2  ;;  %v271_v15 = vpop.f32.mrf.mxu1  ;;  %v120_v16 = vperm.slane %v55_v10, 4 }
  0x89   :  { %v124_v17 = vperm.slane %v55_v10, 5  ;;  %v136_v18 = vperm.slane %v55_v10, 6  ;;  %v87_v23 = vperm.slane %v271_v15, 0  ;;  %v91_v27 = vperm.slane %v271_v15, 1 }
  0x8a   :  { %v88_v19 = vmul.f32 %v86_v12, %v84_v11  ;;  %v92_v20 = vmul.f32 %v90_v13, %v84_v11  ;;  %v104_v21 = vmul.f32 %v102_v14, %v84_v11  ;;  %v122_v24 = vmul.f32 %v120_v16, %v84_v11 }
  0x8b   :  { %v126_v25 = vmul.f32 %v124_v17, %v84_v11  ;;  %v138_v26 = vmul.f32 %v136_v18, %v84_v11  ;;  %v114_v30 = vperm.slane %v55_v10, 3  ;;  %v103_v31 = vperm.slane %v271_v15, 2 }
  0x8c   :  { %v96_v28 = vrot.slane %v92_v20, 2  ;;  %v108_v29 = vrot.slane %v104_v21, 4  ;;  %v89_v34 = vmul.f32 %v87_v23, %v85_v22  ;;  %v93_v35 = vmul.f32 %v91_v27, %v85_v22 }
  0x8d   :  { %v130_v32 = vrot.slane %v126_v25, 2  ;;  %v142_v33 = vrot.slane %v138_v26, 4  ;;  %v105_v37 = vmul.f32 %v103_v31, %v85_v22  ;;  %v121_v38 = vperm.slane %v271_v15, 4  ;;  %v58_v40 = vpop.f32.mrf.mxu2 }
  0x8e   :  { %v100_v36 = vadd.f32 %v96_v28, %v88_v19  ;;  %v125_v39 = vperm.slane %v271_v15, 5  ;;  %v148_v42 = vperm.slane %v55_v10, 7  ;;  %v97_v43 = vrot.slane %v93_v35, 2  ;;  %v81_v57 = vpop.f32.mrf.mxu3 }
  0x8f   :  { %v134_v41 = vadd.f32 %v130_v32, %v122_v24  ;;  %v137_v44 = vperm.slane %v271_v15, 6  ;;  %v109_v46 = vrot.slane %v105_v37, 4  ;;  %v123_v47 = vmul.f32 %v121_v38, %v85_v22 }
  0x90   :  { %v112_v45 = vadd.f32 %v108_v29, %v100_v36  ;;  %v127_v48 = vmul.f32 %v125_v39, %v85_v22  ;;  %v101_v50 = vadd.f32 %v97_v43, %v89_v34  ;;  %v160_v52 = vperm.slane %v58_v40, 0 }
  0x91   :  { %v146_v49 = vadd.f32 %v142_v33, %v134_v41  ;;  %v139_v51 = vmul.f32 %v137_v44, %v85_v22  ;;  %v164_v55 = vperm.slane %v58_v40, 1  ;;  %v176_v56 = vperm.slane %v58_v40, 2 }
  0x92   :  { %v116_v53 = vadd.f32 %v114_v30, %v112_v45  ;;  %v131_v54 = vrot.slane %v127_v48, 2  ;;  %v113_v59 = vadd.f32 %v109_v46, %v101_v50  ;;  %v115_v60 = vperm.slane %v271_v15, 3 }
  0x93   :  { %v150_v58 = vadd.f32 %v148_v42, %v146_v49  ;;  %v143_v61 = vrot.slane %v139_v51, 4  ;;  %v149_v63 = vperm.slane %v271_v15, 7  ;;  %v166_v0 = vmul.f32 %v164_v55, %v84_v11 }
  0x94   :  { %v135_v62 = vadd.f32 %v131_v54, %v123_v47  ;;  %118 = vst [vmem:[%s305_s3] sm:$0x3] %v116_v53  ;;  %v178_v1 = vmul.f32 %v176_v56, %v84_v11  ;;  %v117_v3 = vadd.f32 %v115_v60, %v113_v59  ;;  %v161_v4 = vperm.slane %v81_v57, 0 }
  0x95   :  { %v154_v2 = vrot.slane %v150_v58, 6  ;;  %v165_v5 = vperm.slane %v81_v57, 1  ;;  %v162_v7 = vmul.f32 %v160_v52, %v84_v11  ;;  %v170_v8 = vrot.slane %v166_v0, 2 }
  0x96   :  { %v147_v6 = vadd.f32 %v143_v61, %v135_v62  ;;  %v177_v9 = vperm.slane %v81_v57, 2  ;;  %119 = vst [vmem:[%s305_s3 + $0x8] sm:$0x3] %v117_v3  ;;  %v182_v14 = vrot.slane %v178_v1, 4  ;;  %v163_v16 = vmul.f32 %v161_v4, %v85_v22 }
  0x97   :  { %v167_v10 = vmul.f32 %v165_v5, %v85_v22  ;;  %158 = vst [vmem:[%s305_s3] sm:$0xc] %v154_v2  ;;  %v174_v13 = vadd.f32 %v170_v8, %v162_v7  ;;  %v188_v11 = vperm.slane %v58_v40, 3  ;;  %v189_v25 = vperm.slane %v81_v57, 3 }
  0x98   :  { %v151_v12 = vadd.f32 %v149_v63, %v147_v6  ;;  %v179_v15 = vmul.f32 %v177_v9, %v85_v22 }
  0x99   :  { %v171_v17 = vrot.slane %v167_v10, 2  ;;  %v186_v19 = vadd.f32 %v182_v14, %v174_v13 }
  0x9a   :  { %v155_v18 = vrot.slane %v151_v12, 6  ;;  %v183_v21 = vrot.slane %v179_v15, 4 }
  0x9b   :  { %v175_v20 = vadd.f32 %v171_v17, %v163_v16  ;;  %v190_v23 = vadd.f32 %v188_v11, %v186_v19 }
  0x9c   :  { %159 = vst [vmem:[%s305_s3 + $0x8] sm:$0xc] %v155_v18 }
  0x9d   :  { %v187_v24 = vadd.f32 %v183_v21, %v175_v20  ;;  %v194_v26 = vrot.slane %v190_v23, 4 }
  0x9f   :  { %v191_v27 = vadd.f32 %v189_v25, %v187_v24  ;;  %198 = vst [vmem:[%s305_s3] sm:$0x30] %v194_v26 }
  0xa1   :  { %v195_v22 = vrot.slane %v191_v27, 4 }
  0xa3   :  { %199 = vst [vmem:[%s305_s3 + $0x8] sm:$0x30] %v195_v22 }

</bundles_post_ra>
